<compile_context>
chip_gen: v5e
topology: v5e:2x2
jax: 0.10.0
libtpu: 0.0.40
codegen_flags: <defaults>
</compile_context>

<pallas_src>
import jax
import jax.numpy as jnp
from jax.experimental import pallas as pl
from jax.experimental.pallas import tpu as pltpu


_BLOCK_BUDGET_BYTES = 3 << 20   # target encoder block size per grid step (~3 MiB)


def _multiple_of_8_divisors(n):
    return [d for d in range(8, n + 1, 8) if n % d == 0]


def _choose_tiles(B, S, H, block_budget_bytes):
    """Pick (TB, TS): TB | B with TB % 8 == 0 (or TB == B), TS | S.

    No padding is ever required: TB always divides B and TS always divides S.
    """
    itemsize = 4  # f32
    row_bytes = S * H * itemsize

    legal_tb = _multiple_of_8_divisors(B) or [B]
    fits = [d for d in legal_tb if d * row_bytes <= block_budget_bytes]
    if not fits:
        fits = [legal_tb[0]]            # smallest legal; S tiling shrinks further below
    tb = None
    for steps_goal in (8, 4, 2):        # prefer enough steps for pipelining + megacore
        cand = [d for d in fits if B // d >= steps_goal]
        if cand:
            tb = max(cand)              # biggest block that still yields `steps_goal` steps
            break
    if tb is None:
        tb = max(fits)                  # cannot get >= 2 batch steps without padding

    ts = S
    if tb * S * H * itemsize > block_budget_bytes and S % 128 == 0:
        # Tile S with a multiple-of-128 divisor so the in-kernel dynamic lane-offset
        # score stash stays vreg-aligned.
        cand_ts = [t for t in range(128, S, 128)
                   if S % t == 0 and tb * t * H * itemsize <= block_budget_bytes]
        ts = max(cand_ts) if cand_ts else 128
    return tb, ts


def _make_attention_kernel(n_s_tiles, ts):
    """Builds the kernel body. `n_s_tiles` / `ts` are static Python ints."""

    def kernel(enc_ref, hid_ref, ctx_ref, w_ref, m_ref, l_ref, acc_ref):
        enc = enc_ref[...].astype(jnp.float32)            # (TB, TS, H)
        hid = hid_ref[...].astype(jnp.float32)            # (TB, H)

        # scores[b, t] = sum_h enc[b, t, h] * hid[b, h]   (VPU mul + lane reduce)
        s = jnp.sum(enc * hid[:, None, :], axis=-1)       # (TB, TS)

        if n_s_tiles == 1:
            # Whole sequence resident in the block: plain stable softmax.
            m = jnp.max(s, axis=-1, keepdims=True)
            e = jnp.exp(s - m)
            w = e / jnp.sum(e, axis=-1, keepdims=True)
            ctx = jnp.sum(w[:, :, None] * enc, axis=1)    # (TB, H)
            ctx_ref[...] = ctx.astype(ctx_ref.dtype)
            w_ref[...] = w.astype(w_ref.dtype)
            return

        # -------- long-sequence path: online softmax over the S grid axis --------
        k = pl.program_id(1)

        @pl.when(k == 0)
        def _init():
            m_ref[...] = jnp.full_like(m_ref, -jnp.inf)
            l_ref[...] = jnp.zeros_like(l_ref)
            acc_ref[...] = jnp.zeros_like(acc_ref)

        # Stash this tile's raw scores into the VMEM-resident (TB, S) weights block
        # (lane-aligned: ts % 128 == 0); normalization happens at the final S step.
        off = pl.multiple_of(k * ts, ts)
        w_ref[:, pl.ds(off, ts)] = s.astype(w_ref.dtype)

        m_prev = m_ref[...]
        m_new = jnp.maximum(m_prev, jnp.max(s, axis=-1, keepdims=True))
        alpha = jnp.exp(m_prev - m_new)
        p = jnp.exp(s - m_new)                             # (TB, TS)
        l_ref[...] = alpha * l_ref[...] + jnp.sum(p, axis=-1, keepdims=True)
        acc_ref[...] = alpha * acc_ref[...] + jnp.sum(p[:, :, None] * enc, axis=1)
        m_ref[...] = m_new

        @pl.when(k == n_s_tiles - 1)
        def _finalize():
            inv_l = 1.0 / l_ref[...]
            ctx_ref[...] = (acc_ref[...] * inv_l).astype(ctx_ref.dtype)
            scores = w_ref[...].astype(jnp.float32)        # every S tile written above
            w = jnp.exp(scores - m_ref[...]) * inv_l
            w_ref[...] = w.astype(w_ref.dtype)

    return kernel


def attention(encoder_outputs, decoder_hidden, *,
              block_budget_bytes=_BLOCK_BUDGET_BYTES, interpret=False):
    """Pallas implementation of Attention.forward.

    Args:
      encoder_outputs: (B, S, H) float32
      decoder_hidden:  (B, H) float32
    Returns:
      (context_vector (B, H), attn_weights (B, S))
    """
    B, S, H = encoder_outputs.shape
    assert decoder_hidden.shape == (B, H)
    out_dtype = encoder_outputs.dtype

    TB, TS = _choose_tiles(B, S, H, block_budget_bytes)
    n_b, n_s = B // TB, S // TS
    enc_block_bytes = TB * TS * H * 4

    grid_spec = pltpu.PrefetchScalarGridSpec(
        num_scalar_prefetch=0,
        grid=(n_b, n_s),                                   # reduction (S) axis last
        in_specs=[
            pl.BlockSpec((TB, TS, H), lambda b, k: (b, k, 0)),
            pl.BlockSpec((TB, H), lambda b, k: (b, 0)),
        ],
        out_specs=[
            pl.BlockSpec((TB, H), lambda b, k: (b, 0)),    # context  (resident across k)
            pl.BlockSpec((TB, S), lambda b, k: (b, 0)),    # weights  (resident across k)
        ],
        scratch_shapes=[
            pltpu.VMEM((TB, 1), jnp.float32),              # running row max
            pltpu.VMEM((TB, 1), jnp.float32),              # running softmax denom
            pltpu.VMEM((TB, H), jnp.float32),              # context accumulator
        ],
    )

    # Right-size the VMEM request: 2 pipelined enc buffers + in-body temporaries
    # (bounded by the block size) + the small resident outputs/scratch + headroom.
    vmem_est = 4 * enc_block_bytes + 8 * TB * H * 4 + 4 * TB * S * 4
    vmem_limit = int(min(max(vmem_est + (8 << 20), 16 << 20), 48 << 20))

    ctx, w = pl.pallas_call(
        _make_attention_kernel(n_s, TS),
        out_shape=(
            jax.ShapeDtypeStruct((B, H), out_dtype),
            jax.ShapeDtypeStruct((B, S), out_dtype),
        ),
        grid_spec=grid_spec,
        compiler_params=pltpu.CompilerParams(
            dimension_semantics=("parallel", "arbitrary"),
            vmem_limit_bytes=vmem_limit,
        ),
        interpret=interpret,
    )(encoder_outputs, decoder_hidden)
    return ctx, w


def _reference(encoder_outputs, decoder_hidden):
    # Pure-JAX reference mirroring the PyTorch code exactly.
    scores = jnp.einsum("bsh,bh->bs", encoder_outputs, decoder_hidden)
    attn_weights = jax.nn.softmax(scores, axis=1)
    context = jnp.einsum("bs,bsh->bh", attn_weights, encoder_outputs)
    return context, attn_weights


def _check(B, S, H, key, **kwargs):
    k1, k2 = jax.random.split(key)
    enc = jax.random.normal(k1, (B, S, H), dtype=jnp.float32)
    hid = jax.random.normal(k2, (B, H), dtype=jnp.float32)
    ctx, w = attention(enc, hid, **kwargs)
    jax.block_until_ready((ctx, w))
    ctx_ref, w_ref = _reference(enc, hid)
    assert ctx.shape == (B, H) and w.shape == (B, S)
    assert jnp.allclose(ctx, ctx_ref, atol=1e-5, rtol=1e-5)
    assert jnp.allclose(w, w_ref, atol=1e-5, rtol=1e-5)


if __name__ == "__main__":
    key = jax.random.PRNGKey(0)
    k0, k1, k2 = jax.random.split(key, 3)

    # Module-scale demo shapes (single block; grid (1, 1)).
    _check(2, 8, 32, k0)
    # Multi-step batch tiling on TPU (TB=8 -> grid (4, 1), "parallel" batch axis).
    _check(32, 16, 128, k1)
    # Long-sequence online-softmax path (TS=128 -> grid (1, 2)); validated in
    # interpret mode so the compiled TPU runs above remain the fast path.
    _check(8, 256, 128, k2, block_budget_bytes=256 << 10, interpret=True)

    print("KERNEL_OK")
</pallas_src>

<mosaic_0001>
module attributes {stable_mosaic.version = 11 : i64} {
  func.func @kernel(%arg0: i32, %arg1: i32, %arg2: memref<2x8x32xf32, #tpu.memory_space<vmem>>, %arg3: memref<2x32xf32, #tpu.memory_space<vmem>>, %arg4: memref<2x32xf32, #tpu.memory_space<vmem>>, %arg5: memref<2x8xf32, #tpu.memory_space<vmem>>, %arg6: memref<2x1xf32, #tpu.memory_space<vmem>>, %arg7: memref<2x1xf32, #tpu.memory_space<vmem>>, %arg8: memref<2x32xf32, #tpu.memory_space<vmem>>) attributes {dimension_semantics = [#tpu.dimension_semantics<parallel>, #tpu.dimension_semantics<arbitrary>], iteration_bounds = array<i64: 1, 1>, scalar_prefetch = 0 : i64, scratch_operands = 3 : i64, tpu.core_type = #tpu.core_type<tc>, window_params = [{transform_indices = @transform_0, window_bounds = array<i64: 2, 8, 32>}, {transform_indices = @transform_1, window_bounds = array<i64: 2, 32>}, {transform_indices = @transform_2, window_bounds = array<i64: 2, 32>}, {transform_indices = @transform_3, window_bounds = array<i64: 2, 8>}]} {
    %c0 = arith.constant 0 : index
    %c0_0 = arith.constant 0 : index
    %c0_1 = arith.constant 0 : index
    %0 = vector.load %arg2[%c0, %c0_0, %c0_1] : memref<2x8x32xf32, #tpu.memory_space<vmem>>, vector<2x8x32xf32>
    %c0_2 = arith.constant 0 : index
    %c0_3 = arith.constant 0 : index
    %1 = vector.load %arg3[%c0_2, %c0_3] : memref<2x32xf32, #tpu.memory_space<vmem>>, vector<2x32xf32>
    %2 = vector.shape_cast %1 : vector<2x32xf32> to vector<2x1x32xf32>
    %3 = vector.broadcast %2 : vector<2x1x32xf32> to vector<2x8x32xf32>
    %4 = arith.mulf %0, %3 : vector<2x8x32xf32>
    %cst = arith.constant dense<0.000000e+00> : vector<2x8xf32>
    %5 = vector.multi_reduction <add>, %4, %cst [2] : vector<2x8x32xf32> to vector<2x8xf32>
    %cst_4 = arith.constant dense<0xFF800000> : vector<2xf32>
    %6 = vector.multi_reduction <maximumf>, %5, %cst_4 [1] : vector<2x8xf32> to vector<2xf32>
    %7 = vector.shape_cast %6 : vector<2xf32> to vector<2x1xf32>
    %8 = vector.broadcast %7 : vector<2x1xf32> to vector<2x8xf32>
    %9 = arith.subf %5, %8 : vector<2x8xf32>
    %10 = math.exp %9 : vector<2x8xf32>
    %cst_5 = arith.constant dense<0.000000e+00> : vector<2xf32>
    %11 = vector.multi_reduction <add>, %10, %cst_5 [1] : vector<2x8xf32> to vector<2xf32>
    %12 = vector.shape_cast %11 : vector<2xf32> to vector<2x1xf32>
    %13 = vector.broadcast %12 : vector<2x1xf32> to vector<2x8xf32>
    %14 = arith.divf %10, %13 : vector<2x8xf32>
    %15 = vector.shape_cast %14 : vector<2x8xf32> to vector<2x8x1xf32>
    %16 = vector.broadcast %15 : vector<2x8x1xf32> to vector<2x8x32xf32>
    %17 = arith.mulf %16, %0 : vector<2x8x32xf32>
    %cst_6 = arith.constant dense<0.000000e+00> : vector<2x32xf32>
    %18 = vector.multi_reduction <add>, %17, %cst_6 [1] : vector<2x8x32xf32> to vector<2x32xf32>
    %c0_7 = arith.constant 0 : index
    %c0_8 = arith.constant 0 : index
    %19 = vector.load %arg4[%c0_7, %c0_8] : memref<2x32xf32, #tpu.memory_space<vmem>>, vector<2x32xf32>
    tpu.vector_store %arg4[%c0_7, %c0_8], %18 {strides = array<i32>} : memref<2x32xf32, #tpu.memory_space<vmem>>, vector<2x32xf32>,
    %c0_9 = arith.constant 0 : index
    %c0_10 = arith.constant 0 : index
    %20 = vector.load %arg5[%c0_9, %c0_10] : memref<2x8xf32, #tpu.memory_space<vmem>>, vector<2x8xf32>
    tpu.vector_store %arg5[%c0_9, %c0_10], %14 {strides = array<i32>} : memref<2x8xf32, #tpu.memory_space<vmem>>, vector<2x8xf32>,
    return
  }
  func.func @transform_0(%arg0: i32, %arg1: i32) -> (i32, i32, i32) {
    %c0_i32 = arith.constant 0 : i32
    %c0_i32_0 = arith.constant 0 : i32
    return %arg0, %arg1, %c0_i32 : i32, i32, i32
  }
  func.func @transform_1(%arg0: i32, %arg1: i32) -> (i32, i32) {
    %c0_i32 = arith.constant 0 : i32
    %c0_i32_0 = arith.constant 0 : i32
    return %arg0, %c0_i32 : i32, i32
  }
  func.func @transform_2(%arg0: i32, %arg1: i32) -> (i32, i32) {
    %c0_i32 = arith.constant 0 : i32
    %c0_i32_0 = arith.constant 0 : i32
    return %arg0, %c0_i32 : i32, i32
  }
  func.func @transform_3(%arg0: i32, %arg1: i32) -> (i32, i32) {
    %c0_i32 = arith.constant 0 : i32
    %c0_i32_0 = arith.constant 0 : i32
    return %arg0, %c0_i32 : i32, i32
  }
}

</mosaic_0001>

<bundles_post_ra>
// kernel: tpu_custom_call.1
= control target key start
LH: loop header
LB: loop body
LE: loop exit
PB: predicated region body
PF: predicated region fallthrough
CT: control target
= control target key end

     0   :  { %9 = vsyncpa [#allocation6], 0  ;;  %s396_s0 = inlined_call_operand.hbm [shape: f32[2,8,32], index: 0, kind: input, shape index: {}]   ;;  %s397_s1 = inlined_call_operand.hbm [shape: f32[2,32], index: 1, kind: input, shape index: {}]   ;;  %s398_s2 = inlined_call_operand.hbm [shape: f32[2,32], index: 2, kind: output, shape index: {0}]   ;;  %s399_s3 = inlined_call_operand.hbm [shape: f32[2,8], index: 3, kind: output, shape index: {1}]  }
   0x1   :  { %10 = vsyncpa [#allocation9], 0 }
   0x2   :  { %11 = vsyncpa [#allocation7], 0 }
   0x3   :  { %12 = vsyncpa [#allocation12], 0  ;;  %s17_s14 = sshll.u32 %s396_s0, 4  ;;  %s330_s15 = smov [#allocation5]   ;;  %s18_s14 = int_to_ptr.hbm [resolvable:$true] %s17_s14 }
   0x4   :  { %s19_s16 = sshll.u32 %s330_s15, 4  ;;  %s31_s19 = sshll.u32 %s397_s1, 4  ;;  %s20_s16 = int_to_ptr.vmem [resolvable:$true] %s19_s16  ;;  %s32_s19 = int_to_ptr.hbm [resolvable:$true] %s31_s19 }
   0x5   :  { %s331_s20 = smov 128   ;;  %s332_s21 = smov 8  }
   0x6   :  { %25 = dma.hbm_to_vmem [thread:$0]  %s18_s14, 256, %s20_s16, [#allocation6], %s331_s20, %s331_s20, %s332_s21  }
   0x7   :  { %s333_s22 = smov [#allocation8]  }
   0x8   :  { %s33_s23 = sshll.u32 %s333_s22, 4  ;;  %s34_s23 = int_to_ptr.vmem [resolvable:$true] %s33_s23 }
   0x9   :  { %36 = dma.hbm_to_vmem [thread:$0]  %s32_s19, 32, %s34_s23, [#allocation9]  }
   0xa   :  { %322 = dma.done.wait [#allocation6], 256  }
   0xb   :  { %323 = vsyncadd [#allocation6], 4294967040 }
   0xc   :  { %324 = dma.done.wait [#allocation9], 32  }
   0xd   :  { %325 = vsyncadd [#allocation9], 4294967264  ;;  %v363_v0 = vld [vmem:[#allocation5] sm:$0xff]  ;;  %v47_v1 = vld [vmem:[#allocation8] sm:$0x3]  ;;  %vm56_vm0 = vcmask 261120   ;;  %v65_v11 = vlaneseq }
   0xe   :  { %v50_v2 = vperm.slane %v47_v1, 0  ;;  %v49_v3 = vrot.slane %v47_v1, 1  ;;  %v366_v6 = vld [vmem:[#allocation5 + $0x8] sm:$0xff]  ;;  %vm69_vm1 = vcmask 1041409   ;;  %vm72_vm2 = vcmask 58368   ;;  %s335_s0 = smov [#allocation11]  }
   0xf   :  { %v371_v12 = vand.u32 127, %v65_v11  ;;  %v334_v18 = vmov 0   ;;  %s190_s1 = sshll.u32 %s335_s0, 4  ;;  %s192_s26 = sshll.u32 %s399_s3, 4  ;;  %vm167_vm11 = vcmask 254976   ;;  %s191_s1 = int_to_ptr.vmem [resolvable:$true] %s190_s1  ;;  %s193_s26 = int_to_ptr.hbm [resolvable:$true] %s192_s26 }
  0x10   :  { %v54_v4 = vmul.f32 %v50_v2, %v363_v0  ;;  %v51_v5 = vperm.slane %v49_v3, 0  ;;  %216 = vset.pattern.permute.xlu2 %v334_v18  ;;  %215 = vset.pattern.permute.xlu1 %v334_v18  ;;  %s336_s3 = smov [#allocation10]   ;;  %s181_s30 = sshll.u32 %s398_s2, 4  ;;  %s182_s30 = int_to_ptr.hbm [resolvable:$true] %s181_s30 }
  0x11   :  { %217 = vset.pattern.permute.xlu0 %v334_v18  ;;  %s179_s27 = sshll.u32 %s336_s3, 4  ;;  %s180_s27 = int_to_ptr.vmem [resolvable:$true] %s179_s27 }
  0x12   :  { %v57_v7 = vsel %vm56_vm0, %v54_v4, 0.0  ;;  %v55_v8 = vmul.f32 %v51_v5, %v366_v6 }
  0x13   :  { %58 = vadd.xlane.f32.xlu0 %v57_v7 }
  0x14   :  { %v60_v9 = vsel %vm56_vm0, %v55_v8, 0.0 }
  0x1b   :  { %61 = vadd.xlane.f32.xlu0 %v60_v9 }
  0x86   :  { %v59_v10 = vpop.xlane.xlu0 %58 }
  0x87   :  { %v67_v14 = vperm.slane %v59_v10, %v371_v12 }
  0x8e   :  { %v62_v13 = vpop.xlane.xlu0 %61 }
  0x8f   :  { %v68_v15 = vperm.slane %v62_v13, %v371_v12 }
  0x91   :  { %v70_v16 = vsel %vm69_vm1, %v68_v15, %v67_v14 }
  0x92   :  { %v73_v17 = vsel %vm72_vm2, %v70_v16, -inf }
  0x93   :  { %74 = vmax.xlane.f32.xlu1 %v73_v17 }
 0x106   :  { %v75_v19 = vpop.xlane.xlu1 %74 }
 0x107   :  { %v77_v20 = vperm.slane %v75_v19, 0  ;;  %v78_v21 = vperm.slane %v75_v19, 1 }
 0x109   :  { %v81_v22 = vsub.f32 %v59_v10, %v77_v20  ;;  %v82_v23 = vsub.f32 %v62_v13, %v78_v21 }
 0x10b   :  { %v83_v24 = vmul.f32 1.442695, %v81_v22  ;;  %v85_v25 = vmul.f32 1.442695, %v82_v23 }
 0x10d   :  { %218 = vpow2.f32 %v83_v24 }
 0x10e   :  { %220 = vpow2.f32 %v85_v25 }
 0x113   :  { %v219_v26 = vpop.eup %218 }
 0x114   :  { %v221_v27 = vpop.eup %220  ;;  %90 = vperm.xlu1 %215, %v219_v26  }
 0x115   :  { %93 = vperm.xlu2 %216, %v221_v27  }
 0x16f   :  { %v94_v28 = vpop.permute.xlu2 %93 }
 0x170   :  { %v96_v30 = vperm.slane %v94_v28, %v371_v12 }
 0x186   :  { %v91_v29 = vpop.permute.xlu1 %90 }
 0x187   :  { %v95_v31 = vperm.slane %v91_v29, %v371_v12 }
 0x189   :  { %v97_v32 = vsel %vm69_vm1, %v96_v30, %v95_v31 }
 0x18a   :  { %v99_v33 = vsel %vm72_vm2, %v97_v32, 0.0 }
 0x18b   :  { %100 = vadd.xlane.f32.xlu2 %v99_v33 }
 0x1fe   :  { %v101_v34 = vpop.xlane.xlu2 %100 }
 0x1ff   :  { %v103_v35 = vperm.slane %v101_v34, 0  ;;  %v104_v36 = vperm.slane %v101_v34, 1 }
 0x201   :  { %222 = vrcp.f32 %v103_v35  ;;  %v118_v43 = vand.u32 2147483648, %v103_v35  ;;  %v133_v44 = vand.u32 2147483648, %v104_v36  ;;  %v116_v46 = vand.u32 2147483647, %v103_v35 }
 0x202   :  { %224 = vrcp.f32 %v104_v36  ;;  %v131_v48 = vand.u32 2147483647, %v104_v36  ;;  %vm112_vm5 = vweird.f32 %v103_v35  ;;  %vm127_vm6 = vweird.f32 %v104_v36 }
 0x203   :  { %v119_v51 = vor.u32 1.1754944e-38, %v118_v43  ;;  %v134_v52 = vor.u32 1.1754944e-38, %v133_v44  ;;  %vm117_vm9 = vcmp.eq.f32.partialorder %v116_v46, 8.507059e+37 }
 0x204   :  { %vm132_vm10 = vcmp.eq.f32.partialorder %v131_v48, 8.507059e+37 }
 0x207   :  { %v223_v37 = vpop.eup %222 }
 0x208   :  { %v225_v38 = vpop.eup %224  ;;  %v108_v39 = vmul.f32 %v223_v37, %v103_v35  ;;  %vm113_vm3 = vweird.f32 %v223_v37 }
 0x209   :  { %v123_v40 = vmul.f32 %v225_v38, %v104_v36  ;;  %vm128_vm4 = vweird.f32 %v225_v38  ;;  %vm114_vm7 = vmor %vm112_vm5, %vm113_vm3 }
 0x20a   :  { %v109_v41 = vsub.f32 1.0, %v108_v39  ;;  %vm129_vm8 = vmor %vm127_vm6, %vm128_vm4 }
 0x20b   :  { %v124_v42 = vsub.f32 1.0, %v123_v40 }
 0x20c   :  { %v110_v45 = vmul.f32 %v223_v37, %v109_v41 }
 0x20d   :  { %v125_v47 = vmul.f32 %v225_v38, %v124_v42 }
 0x20e   :  { %v111_v49 = vadd.f32 %v223_v37, %v110_v45 }
 0x20f   :  { %v126_v50 = vadd.f32 %v225_v38, %v125_v47 }
 0x210   :  { %v115_v53 = vsel %vm114_vm7, %v223_v37, %v111_v49 }
 0x211   :  { %v130_v54 = vsel %vm129_vm8, %v225_v38, %v126_v50  ;;  %v120_v55 = vsel %vm117_vm9, %v119_v51, %v115_v53 }
 0x212   :  { %v135_v56 = vsel %vm132_vm10, %v134_v52, %v130_v54  ;;  %v121_v57 = vmul.f32 %v219_v26, %v120_v55 }
 0x213   :  { %v136_v58 = vmul.f32 %v221_v27, %v135_v56 }
 0x214   :  { %139 = vperm.xlu0 %217, %v121_v57  }
 0x215   :  { %144 = vperm.xlu1 %215, %v136_v58  }
 0x286   :  { %v140_v59 = vpop.permute.xlu0 %139 }
 0x287   :  { %v145_v60 = vpop.permute.xlu1 %144  ;;  %v147_v61 = vmul.f32 %v140_v59, %v363_v0  ;;  %v169_v62 = vperm.slane %v140_v59, %v371_v12 }
 0x288   :  { %v148_v63 = vmul.f32 %v145_v60, %v366_v6  ;;  %v170_v1 = vperm.slane %v145_v60, %v371_v12 }
 0x289   :  { %v149_v2 = vsel %vm56_vm0, %v147_v61, 0.0 }
 0x28a   :  { %v156_v3 = vsel %vm56_vm0, %v148_v63, 0.0  ;;  %v150_v4 = vrot.slane %v149_v2, 4  ;;  %v171_v5 = vsel %vm69_vm1, %v170_v1, %v169_v62 }
 0x28b   :  { %v157_v7 = vrot.slane %v156_v3, 4  ;;  %173 = vst.msk [vmem:[#allocation11] sm:$0x3] %vm72_vm2, %v171_v5 }
 0x28c   :  { %v151_v8 = vadd.f32 %v150_v4, %v149_v2  ;;  %195 = dma.vmem_to_hbm [thread:$0]  %s191_s1, 32, %s193_s26, [#allocation12]  }
 0x28d   :  { %v158_v0 = vadd.f32 %v157_v7, %v156_v3 }
 0x28e   :  { %v152_v9 = vrot.slane %v151_v8, 2 }
 0x28f   :  { %v159_v10 = vrot.slane %v158_v0, 2 }
 0x290   :  { %v153_v6 = vadd.f32 %v152_v9, %v151_v8 }
 0x291   :  { %v160_v11 = vadd.f32 %v159_v10, %v158_v0 }
 0x292   :  { %v154_v12 = vrot.slane %v153_v6, 1 }
 0x293   :  { %v161_v13 = vrot.slane %v160_v11, 1 }
 0x294   :  { %v155_v14 = vadd.f32 %v154_v12, %v153_v6 }
 0x295   :  { %v162_v15 = vadd.f32 %v161_v13, %v160_v11 }
 0x297   :  { %v165_v16 = vsel %vm69_vm1, %v162_v15, %v155_v14 }
 0x298   :  { %168 = vst.msk [vmem:[#allocation10] sm:$0x3] %vm167_vm11, %v165_v16 }
 0x299   :  { %184 = dma.vmem_to_hbm [thread:$0]  %s180_s27, 32, %s182_s30, [#allocation7]  }
 0x29a   :  { %326 = dma.done.wait [#allocation7], 32  }
 0x29b   :  { %327 = vsyncadd [#allocation7], 4294967264 }
 0x29c   :  { %328 = dma.done.wait [#allocation12], 32  }
 0x29d   :  { %329 = vsyncadd [#allocation12], 4294967264 }
 0x29e   :  { %204 = vsyncpa [#allocation6], 1 }
 0x29f   :  { %205 = vsyncpa [#allocation9], 1 }
 0x2a0   :  { %206 = vsyncpa [#allocation7], 1 }
 0x2a1   :  { %207 = vsyncpa [#allocation12], 1 }

</bundles_post_ra>
